<compile_context>
chip_gen: v7x
topology: tpu7x:2x2x1
jax: 0.10.0
libtpu: 0.0.40
codegen_flags: <defaults>
</compile_context>

<pallas_src>
import jax
import jax.numpy as jnp
import numpy as np
from jax.experimental import pallas as pl
from jax.experimental.pallas import tpu as pltpu


# ----------------------------- Pallas kernel -------------------------------

def _proj_kernel(x_ref, w_ref, b_ref, o_ref):
    # x_ref: (TM, K) bf16/f32    w_ref: (K, Npad) bf16/f32
    # b_ref: (1, Npad) f32       o_ref: (TM, Npad) bf16/f32
    # MXU matmul with f32 accumulation; bias add stays f32 on the VPU
    # (v5e has no bf16 VPU); single cast at the store.
    acc = jnp.dot(x_ref[...], w_ref[...], preferred_element_type=jnp.float32)
    o_ref[...] = (acc + b_ref[...]).astype(o_ref.dtype)


def _round_up(x, m):
    return ((x + m - 1) // m) * m


def _choose_tm(M, tm_max):
    """Row-tile size.

    Requirements:
      * multiple of 16 (bf16 sublane packing; also satisfies f32's 8) unless
        the block equals the full M extent (always legal);
      * grid_m >= 2 whenever M allows it, so v7x megacore sharding of the
        "parallel" axis gives both TensorCores work  [R3];
      * capped at tm_max (VMEM + pipelining granularity)  [R4].
    """
    if M <= 16:
        return M                      # full-extent block, grid_m = 1
    tm = min(tm_max, _round_up(pl.cdiv(M, 2), 16))
    return max(16, tm)


def _linear_proj(x2d, weight_p, bias_p, *, tm_max=1024):
    """Row-tiled linear projection on the MXU.

    x2d:      (M, K)      bf16 (or f32)
    weight_p: (K, Npad)   same dtype as x2d, pre-padded to Npad = ceil128(N)
    bias_p:   (1, Npad)   f32, pre-padded
    returns   (M, Npad)   x2d.dtype   (lane-dense, padded; caller slices)
    """
    M, K = x2d.shape
    Kw, n_pad = weight_p.shape
    assert Kw == K and n_pad % 128 == 0 and bias_p.shape == (1, n_pad)

    out_dtype = x2d.dtype                                 # [R2] bf16 output
    tm = _choose_tm(M, tm_max)
    grid_m = pl.cdiv(M, tm)

    # VMEM budget: double-buffered x tile + double-buffered out tile, plus the
    # VMEM-resident weight and bias (constant index_maps).  Cap at 32 MiB so
    # there is headroom under v7x's 64 MiB physical VMEM.  [R6]
    x_bytes = jnp.dtype(x2d.dtype).itemsize
    w_bytes = jnp.dtype(weight_p.dtype).itemsize
    o_bytes = jnp.dtype(out_dtype).itemsize
    vmem_needed = (2 * tm * K * x_bytes            # double-buffered x tiles
                   + 2 * tm * n_pad * o_bytes      # double-buffered out tiles
                   + K * n_pad * w_bytes           # resident weight
                   + n_pad * 4)                    # resident bias
    vmem_limit = int(min(max(2 * vmem_needed, 8 * 1024 * 1024),
                         32 * 1024 * 1024))

    # Advisory cost estimate so XLA schedules producer/consumer ops around the
    # custom call sensibly.  [R9]
    cost = pl.CostEstimate(
        flops=2 * M * K * n_pad,
        transcendentals=0,
        bytes_accessed=(M * K * x_bytes + K * n_pad * w_bytes
                        + n_pad * 4 + M * n_pad * o_bytes))

    out = pl.pallas_call(
        _proj_kernel,
        out_shape=jax.ShapeDtypeStruct((M, n_pad), out_dtype),
        grid_spec=pltpu.PrefetchScalarGridSpec(
            num_scalar_prefetch=0,
            grid=(grid_m,),
            in_specs=[
                # x: one row tile per grid step (double-buffered by Pallas).
                pl.BlockSpec((tm, K), lambda i: (i, 0)),
                # weight / bias: constant index_map -> VMEM-resident.
                pl.BlockSpec((K, n_pad), lambda i: (0, 0)),
                pl.BlockSpec((1, n_pad), lambda i: (0, 0)),
            ],
            out_specs=pl.BlockSpec((tm, n_pad), lambda i: (i, 0)),
        ),
        compiler_params=pltpu.CompilerParams(
            dimension_semantics=("parallel",),      # megacore on v7x
            vmem_limit_bytes=vmem_limit,
            # Best-effort: let XLA fuse the patchify transpose/reshape/cast
            # producing x into the kernel input instead of a separate HBM
            # pass (see [R1] header comment for how to verify).
            allow_input_fusion=[True, False, False],
        ),
        cost_estimate=cost,
    )(x2d, weight_p, bias_p)

    # NOTE [R7]: return the padded, lane-dense buffer; the caller decides
    # when (or whether) to slice back to emb_dim.
    return out


# ----------------------------- Module wrapper -------------------------------

class PatchEmbeddings:
    """JAX/Pallas port of the PyTorch PatchEmbeddings module.

    NOTE: with use_bf16=True the MXU consumes bf16 operands (f32 accumulate)
    and the output is stored in bf16, so results differ from a pure-f32
    PyTorch reference by ~1e-2 relative.  Set use_bf16=False for f32 parity.
    """

    def __init__(self, patch_size: int, patch_dim: int, emb_dim: int, key,
                 *, use_bf16: bool = True):
        self.patch_size = patch_size
        self.patch_dim = patch_dim
        self.emb_dim = emb_dim
        self.n_pad = _round_up(emb_dim, 128)       # lane-dense output width

        # Deterministic init mirroring nn.Linear defaults:
        # U(-1/sqrt(fan_in), 1/sqrt(fan_in)) for both weight and bias.
        kw, kb = jax.random.split(key)
        bound = 1.0 / np.sqrt(patch_dim)
        # PyTorch stores weight as (out, in); we keep (in, out) for the matmul.
        weight = jax.random.uniform(
            kw, (patch_dim, emb_dim), jnp.float32, minval=-bound, maxval=bound)
        bias = jax.random.uniform(
            kb, (emb_dim,), jnp.float32, minval=-bound, maxval=bound)
        self.weight = weight            # unpadded f32 (kept for reference)
        self.bias = bias

        # MXU compute dtype: bf16 inputs, f32 accumulation; bf16 output.
        self.compute_dtype = jnp.bfloat16 if use_bf16 else jnp.float32

        # [R5] Pre-pad + pre-cast ONCE: padded bf16 weight and padded (1,Npad)
        # f32 bias are the only copies fed to the kernel (no per-call pad/cast).
        pad_n = self.n_pad - emb_dim
        self.weight_p = jnp.pad(weight, ((0, 0), (0, pad_n))).astype(
            self.compute_dtype)
        self.bias_p = jnp.pad(bias, (0, pad_n)).reshape(1, self.n_pad).astype(
            jnp.float32)

        # [R8] patch_dim < 256 under-fills the 256-deep MXU on v6e/v7x, but
        # the kernel is HBM-bound, so we deliberately do NOT zero-pad K.

    def __call__(self, x):
        # x: (B, C, H, W)  (NCHW, like PyTorch)
        B, C, H, W = x.shape
        P = self.patch_size
        assert H % P == 0 and W % P == 0
        h, w = H // P, W // P
        # Rearrange 'b c (h p1) (w p2) -> b (h w) (c p1 p2)' — layout glue.
        # See [R1] in the header: kept wrapper-side (XLA transpose emitter),
        # with allow_input_fusion hinting XLA to absorb it into the kernel's
        # input DMA.  Cast to the MXU dtype fuses into the same copy.
        xp = x.reshape(B, C, h, P, w, P)
        xp = jnp.transpose(xp, (0, 2, 4, 1, 3, 5))      # (B, h, w, C, P, P)
        x2d = xp.reshape(B * h * w, C * P * P).astype(self.compute_dtype)
        assert x2d.shape[-1] == self.patch_dim

        y_pad = _linear_proj(x2d, self.weight_p, self.bias_p)   # (M, Npad)

        # [R7] In a full model you would keep the padded lane-dense layout and
        # slice only at the very end; here we slice once to return the exact
        # module output shape (no-op when emb_dim is already a 128-multiple).
        y2d = y_pad[:, :self.emb_dim] if self.n_pad != self.emb_dim else y_pad
        return y2d.reshape(B, h * w, self.emb_dim)


# ----------------------------------- main -----------------------------------

if __name__ == "__main__":
    key = jax.random.PRNGKey(0)
    k_x, k_params = jax.random.split(key)

    # Small shapes consistent with the module:
    B, C, H, W = 2, 4, 16, 16
    patch_size = 4
    patch_dim = C * patch_size * patch_size      # 64
    emb_dim = 32

    x = jax.random.normal(k_x, (B, C, H, W), dtype=jnp.float32)

    mod = PatchEmbeddings(patch_size, patch_dim, emb_dim, k_params)
    out = mod(x)
    out = jax.block_until_ready(out)

    # Reference check (pure JAX) of the same forward pass, using the same
    # bf16-quantized operands the kernel feeds to the MXU (f32 accumulate,
    # bf16 store).
    h, w = H // patch_size, W // patch_size
    xr = x.reshape(B, C, h, patch_size, w, patch_size)
    xr = jnp.transpose(xr, (0, 2, 4, 1, 3, 5)).reshape(B, h * w, patch_dim)
    xr_c = xr.astype(mod.compute_dtype).astype(jnp.float32)
    w_c = mod.weight_p[:, :emb_dim].astype(jnp.float32)
    ref = xr_c @ w_c + mod.bias
    np.testing.assert_allclose(np.asarray(out, dtype=np.float32),
                               np.asarray(ref, dtype=np.float32),
                               rtol=2e-2, atol=2e-2)
    assert out.shape == (B, h * w, emb_dim)

    print("KERNEL_OK")
</pallas_src>

<mosaic_0001>
module attributes {stable_mosaic.version = 11 : i64} {
  func.func @_proj_kernel(%arg0: i32, %arg1: memref<16x64xbf16, #tpu.memory_space<vmem>>, %arg2: memref<64x128xbf16, #tpu.memory_space<vmem>>, %arg3: memref<1x128xf32, #tpu.memory_space<vmem>>, %arg4: memref<16x128xbf16, #tpu.memory_space<vmem>>) attributes {dimension_semantics = [#tpu.dimension_semantics<parallel>], iteration_bounds = array<i64: 2>, scalar_prefetch = 0 : i64, scratch_operands = 0 : i64, tpu.core_type = #tpu.core_type<tc>, window_params = [{transform_indices = @transform_0, window_bounds = array<i64: 16, 64>}, {pipeline_mode = #tpu.pipeline_mode<synchronous>, transform_indices = @transform_1, window_bounds = array<i64: 64, 128>}, {pipeline_mode = #tpu.pipeline_mode<synchronous>, transform_indices = @transform_2, window_bounds = array<i64: 1, 128>}, {transform_indices = @transform_3, window_bounds = array<i64: 16, 128>}]} {
    %c0 = arith.constant 0 : index
    %c0_0 = arith.constant 0 : index
    %0 = vector.load %arg1[%c0, %c0_0] : memref<16x64xbf16, #tpu.memory_space<vmem>>, vector<16x64xbf16>
    %c0_1 = arith.constant 0 : index
    %c0_2 = arith.constant 0 : index
    %1 = vector.load %arg2[%c0_1, %c0_2] : memref<64x128xbf16, #tpu.memory_space<vmem>>, vector<64x128xbf16>
    %cst = arith.constant dense<0.000000e+00> : vector<16x128xf32>
    %2 = tpu.matmul %0, %1, %cst {dimension_numbers = #tpu.dot_dimension_numbers<[1], [0], [0], [1], [0, 0, 1, 1], [], []>} : vector<16x64xbf16>, vector<64x128xbf16>, vector<16x128xf32> -> vector<16x128xf32>
    %c0_3 = arith.constant 0 : index
    %c0_4 = arith.constant 0 : index
    %3 = vector.load %arg3[%c0_3, %c0_4] : memref<1x128xf32, #tpu.memory_space<vmem>>, vector<1x128xf32>
    %4 = vector.broadcast %3 : vector<1x128xf32> to vector<16x128xf32>
    %5 = arith.addf %2, %4 : vector<16x128xf32>
    %6 = arith.truncf %5 : vector<16x128xf32> to vector<16x128xbf16>
    %c0_5 = arith.constant 0 : index
    %c0_6 = arith.constant 0 : index
    %7 = vector.load %arg4[%c0_5, %c0_6] : memref<16x128xbf16, #tpu.memory_space<vmem>>, vector<16x128xbf16>
    tpu.vector_store %arg4[%c0_5, %c0_6], %6 {strides = array<i32>} : memref<16x128xbf16, #tpu.memory_space<vmem>>, vector<16x128xbf16>,
    return
  }
  func.func @transform_0(%arg0: i32) -> (i32, i32) {
    %c0_i32 = arith.constant 0 : i32
    %c0_i32_0 = arith.constant 0 : i32
    return %arg0, %c0_i32 : i32, i32
  }
  func.func @transform_1(%arg0: i32) -> (i32, i32) {
    %c0_i32 = arith.constant 0 : i32
    %c0_i32_0 = arith.constant 0 : i32
    %c0_i32_1 = arith.constant 0 : i32
    return %c0_i32, %c0_i32_0 : i32, i32
  }
  func.func @transform_2(%arg0: i32) -> (i32, i32) {
    %c0_i32 = arith.constant 0 : i32
    %c0_i32_0 = arith.constant 0 : i32
    %c0_i32_1 = arith.constant 0 : i32
    return %c0_i32, %c0_i32_0 : i32, i32
  }
  func.func @transform_3(%arg0: i32) -> (i32, i32) {
    %c0_i32 = arith.constant 0 : i32
    %c0_i32_0 = arith.constant 0 : i32
    return %arg0, %c0_i32 : i32, i32
  }
}

</mosaic_0001>

<bundles_post_ra>
// kernel: tpu_custom_call.1
= control target key start
LH: loop header
LB: loop body
LE: loop exit
PB: predicated region body
PF: predicated region fallthrough
CT: control target
= control target key end

     0   :  { %8 = vsyncpa [#allocation3], 0  ;;  %s893_s0 = inlined_call_operand.hbm [shape: bf16[32,64], index: 0, kind: input, shape index: {}]   ;;  %s894_s1 = inlined_call_operand.hbm [shape: bf16[64,128], index: 1, kind: input, shape index: {}]   ;;  %s895_s2 = inlined_call_operand.vmem [shape: f32[1,128], index: 2, kind: input, shape index: {}]   ;;  %s896_s3 = inlined_call_operand.hbm [shape: bf16[32,128], index: 3, kind: output, shape index: {}]  }
   0x1   :  { %10 = vsyncpa [#allocation3 + $0x1], 0 }
   0x2   :  { %11 = vsyncpa [#allocation6], 0 }
   0x3   :  { %12 = vsyncpa [#allocation4], 0 }
   0x4   :  { %14 = vsyncpa [#allocation4 + $0x1], 0  ;;  %s683_s12 = smov 0   ;;  %s685_s13 = smov 0  }
   0x5   :  { %s687_s14 = smov 0   ;;  %s689_s15 = smov 0  }
   0x6 LB: > { %s704_s16 = sadd.s32 4294967295, %s652_s15   ;;  %s405_s17 = sadd.s32 4294967294, %s652_s15   ;;  %s652_s15 = sphi %s689_s15, %s916_s15   ;;  %s648_s14 = sphi %s687_s14, %s915_s14   ;;  %s644_s13 = sphi %s685_s13, %s914_s13   ;;  %s640_s12 = sphi %s683_s12, %s913_s12  }
   0x7   : > { %p40_p0 = scmp.ne.s32.totalorder %s644_s13, %s640_s12  ;;  %p897_p1 = scmp.eq.s32.totalorder %s704_s16, 0 }
   0x8   : > { %p112_p3 = scmp.eq.s32.totalorder %s405_s17, 1  ;;  %p406_p5 = scmp.ge.s32.totalorder %s652_s15, 1 }
   0x9   : > { %p713_p4 = por %p897_p1, %p40_p0  ;;  %p119_p7 = scmp.lt.s32.totalorder %s652_s15, 3 }
   0xa   : > { %p718_p6 = por %p112_p3, %p40_p0  ;;  %s654_s21 = smov [#allocation5]  }
   0xb   : > { %s900_s18 = scalar_select %p713_p4, 1, 0 }
   0xc   : > { %s901_s19 = scalar_select %p718_p6, 1, 0 }
   0xd   : > { %p723_p8 = pnand %p406_p5, %p119_p7  ;;  %s131_s22 = sshll.u32 %s654_s21, 4  ;;  %s727_s22 = int_to_ptr.vmem [resolvable:$true] %s131_s22 }
   0xe   : > { %s739_s24 = sadd.s32 1, %s652_s15   ;;  %s27_s25 = sadd.s32 1, %s648_s14 }
   0xf   : > { %s902_s20 = scalar_select %p723_p8, 1, 0 }
  0x10   : > { %p464_p9 = pneg %p723_p8  ;;  %s24_s26 = ssub.s32 %s652_s15, %s739_s24 }
  0x11   : > { %s524_s29 = scalar_lea.hbm %s894_s1, 512 }
  0x12   : > { %p734_p11 = pnand %p464_p9, %p897_p1  ;;  %p525_p12 = scmp.ne.s32.totalorder %s894_s1, %s524_s29 }
  0x13   : > { %p531_p5 = scmp.lt.u32.totalorder %s524_s29, %s894_s1 }
  0x14   : > { %p526_p13 = pneg %p734_p11 }
  0x16   : > { %p527_p0 = pnand %p526_p13, %p525_p12 }
  0x18   : > { %p528_p3 = pneg %p527_p0 }
  0x1a   : > { %p533_p7 = pnand %p531_p5, %p528_p3 }
  0x1c   : > { %536 = shalt.err (!%p533_p7)
}
  0x1d   : > { %s537_s7 = scalar_lea.vmem %s727_s22, 512  ;;  %p545_p2 = scmp.lt.s32.totalorder %s727_s22, %s727_s22 }
  0x1e   : > { %p538_p9 = scmp.ne.s32.totalorder %s727_s22, %s537_s7  ;;  %p546_p6 = scmp.lt.s32.totalorder %s537_s7, %s537_s7 }
  0x20   : > { %p540_p10 = pnand %p538_p9, %p526_p13  ;;  %p547_p4 = por %p546_p6, %p545_p2 }
  0x22   : > { %p541_p1 = pneg %p540_p10 }
  0x24   : > { %p548_p8 = pnand %p547_p4, %p541_p1 }
  0x26   : > { %551 = shalt.err (!%p548_p8)
}
  0x27   : > { %s655_s8 = smov 64   ;;  %s656_s9 = smov 4  }
  0x28   : > { %467 = dma.hbm_to_vmem [thread:$0]  (!%p734_p11), %s894_s1, 512, %s727_s22, [#allocation6], %s655_s8, %s655_s8, %s656_s9  }
  0x29   : > { %p25_p1 = scmp.eq.s32.totalorder %s24_s26, 0  ;;  %p34_p2 = scmp.ne.s32.totalorder %s648_s14, %s644_s13 }
  0x2a   : > { %p35_p4 = scmp.eq.s32.totalorder %s652_s15, 0  ;;  %p477_p6 = scmp.lt.s32.totalorder %s652_s15, 2 }
  0x2b   : > { %s773_s17 = scalar_select %p25_p1, %s648_s14, %s27_s25  }
  0x2c   : > { %p36_p8 = por %p35_p4, %p34_p2  ;;  %p904_p10 = scmp.eq.s32.totalorder %s704_s16, 1 }
  0x2d   : > { %s148_s23 = sand.u32 1, %s648_s14   ;;  %s430_s27 = sshll.u32 %s652_s15, 7 }
  0x2e   : > { %p777_p12 = por %p904_p10, %p34_p2  ;;  %s409_s28 = sshll.u32 %s148_s23, 3 }
  0x2f   : > { %s786_s4 = scalar_lea.hbm %s893_s0, %s430_s27  ;;  %s152_s22 = scalar_lea.vmem [#allocation2], %s409_s28 }
  0x30   : > { %s159_s25 = sshll.u32 %s152_s22, 4  ;;  %p788_p11 = pnand %p477_p6, %p36_p8  ;;  %s792_s25 = int_to_ptr.vmem [resolvable:$true] %s159_s25 }
  0x31   : > { %s794_s5 = scalar_lea.sflag [#allocation3], %s148_s23  ;;  %s552_s6 = scalar_lea.hbm %s786_s4, 128 }
  0x32   : > { %p553_p13 = scmp.ne.s32.totalorder %s786_s4, %s552_s6  ;;  %p554_p0 = pneg %p788_p11 }
  0x33   : > { %s557_s11 = scalar_lea.hbm %s893_s0, 256  ;;  %p558_p7 = scmp.lt.u32.totalorder %s786_s4, %s893_s0 }
  0x34   : > { %p555_p3 = pnand %p554_p0, %p553_p13  ;;  %p559_p9 = scmp.lt.u32.totalorder %s557_s11, %s552_s6 }
  0x35   : > { %p561_p2 = scmp.lt.u32.totalorder %s552_s6, %s786_s4 }
  0x36   : > { %p556_p5 = pneg %p555_p3  ;;  %p560_p1 = por %p559_p9, %p558_p7 }
  0x38   : > { %p562_p4 = por %p561_p2, %p560_p1 }
  0x3a   : > { %p563_p6 = pnand %p562_p4, %p556_p5 }
  0x3c   : > { %566 = shalt.err (!%p563_p6)
}
  0x3d   : > { %s567_s23 = scalar_lea.vmem %s792_s25, 128  ;;  %s657_s29 = smov [#allocation2]  }
  0x3e   : > { %p568_p8 = scmp.ne.s32.totalorder %s792_s25, %s567_s23  ;;  %s572_s30 = sshll.u32 %s657_s29, 4  ;;  %s573_s30 = int_to_ptr.vmem [resolvable:$false] %s572_s30 }
  0x3f   : > { %s574_s22 = scalar_lea.vmem %s573_s30, 256  ;;  %p575_p3 = scmp.lt.s32.totalorder %s792_s25, %s573_s30 }
  0x40   : > { %p570_p10 = pnand %p568_p8, %p554_p0  ;;  %p576_p7 = scmp.lt.s32.totalorder %s574_s22, %s567_s23 }
  0x42   : > { %p571_p13 = pneg %p570_p10  ;;  %p577_p9 = por %p576_p7, %p575_p3 }
  0x44   : > { %p578_p1 = pnand %p577_p9, %p571_p13 }
  0x46   : > { %581 = shalt.err (!%p578_p1)
}
  0x47   : > { %471 = dma.hbm_to_vmem [thread:$0]  (!%p788_p11), %s786_s4, 128, %s792_s25, %s794_s5, %s655_s8, %s655_s8, %s656_s9  }
  0x48   : > { %p907_p0 = scmp.ne.s32.totalorder %s902_s20, 0 }
  0x49   : > { %s828_s6 = sand.u32 (!%p907_p0), 1, %s644_s13   ;;  %p908_p5 = scmp.ne.s32.totalorder (!%p907_p0), %s900_s18, 0 }
  0x4a   : > { %171 = sbr.rel (%p907_p0) target bundleno = 335 (0x14f), region = 32  ;;  %s413_s7 = sshll.u32 (!%p907_p0), %s828_s6, 3 }
  0x4b   : > { %s174_s10 = scalar_lea.sflag (!%p907_p0), [#allocation3], %s828_s6  ;;  %s177_s11 = scalar_lea.vmem (!%p907_p0), [#allocation2], %s413_s7 }
  0x51   : > { %627 = dma.done.wait (%p908_p5), %s174_s10, 128  }
  0x52   : > { %629 = vsyncadd (%p908_p5), %s174_s10, 4294967168  ;;  %p909_p2 = scmp.eq.s32.totalorder %s704_s16, 0 }
  0x54   : > { %631 = dma.done.wait (%p909_p2), [#allocation6], 512   ;;  %p910_p11 = pmov %p909_p2 }
  0x55   : > { %v658_v0 = vmov 0.0   ;;  %vm659_vm0 = vmmov 0   ;;  %v519_v1 = vld [vmem:[#allocation5] sm:$0xff]   ;;  %v520_v2 = vld [vmem:[#allocation5 + $0x8] sm:$0xff]   ;;  %v521_v3 = vld [vmem:[#allocation5 + $0x10] sm:$0xff]   ;;  %vm253_vm1 = vcmask 523264  }
  0x56   : > { %633 = vsyncadd (%p910_p11), [#allocation6], 4294966784  ;;  %444 = vmatprep.subr.bf16.mxu0 %v658_v0  ;;  %452 = vmatprep.mubr.msk.bf16.mxu0 %vm659_vm0, %v658_v0  ;;  %v522_v4 = vld [vmem:[#allocation5 + $0x18] sm:$0xff]   ;;  %v416_v6 = vld [vmem:[%s895_s2] ss:$0 sm:$0xff]  ;;  %s203_s8 = scalar_lea.vmem [#allocation7], %s413_s7 }
  0x57   : > { %445 = vmatpush3.bf16.msra.mxu0 %v519_v1  ;;  %v523_v5 = vld [vmem:[%s177_s11] sm:$0xff]   ;;  %s322_s9 = sshll.u32 %s203_s8, 4  ;;  %s433_s4 = sshll.u32 %s704_s16, 7  ;;  %s844_s9 = int_to_ptr.vmem [resolvable:$true] %s322_s9 }
  0x58   : > { %446 = vmatprep.subr.bf16.mxu0 %v658_v0  ;;  %s849_s5 = scalar_lea.hbm %s896_s3, %s433_s4  ;;  %s309_s27 = scalar_lea.sflag [#allocation4], %s828_s6 }
  0x59   : > { %s582_s28 = scalar_lea.vmem %s844_s9, 128  ;;  %s660_s16 = smov [#allocation7]  }
  0x5a   : > { %p583_p4 = scmp.ne.s32.totalorder %s844_s9, %s582_s28  ;;  %s586_s23 = sshll.u32 %s660_s16, 4  ;;  %s587_s23 = int_to_ptr.vmem [resolvable:$false] %s586_s23 }
  0x5b   : > { %447 = vmatpush3.bf16.msra.mxu0 %v520_v2  ;;  %s588_s29 = scalar_lea.vmem %s587_s23, 256  ;;  %p589_p10 = scmp.lt.s32.totalorder %s844_s9, %s587_s23 }
  0x5c   : > { %448 = vmatprep.subr.bf16.mxu0 %v658_v0  ;;  %p584_p6 = pnand %p583_p4, %p777_p12  ;;  %p590_p13 = scmp.lt.s32.totalorder %s588_s29, %s582_s28 }
  0x5e   : > { %p585_p8 = pneg %p584_p6  ;;  %p591_p3 = por %p590_p13, %p589_p10 }
  0x5f   : > { %449 = vmatpush3.bf16.msra.mxu0 %v521_v3 }
  0x60   : > { %450 = vmatprep.subr.bf16.mxu0 %v658_v0  ;;  %p592_p7 = pnand %p591_p3, %p585_p8 }
  0x63   : > { %451 = vmatpush3.bf16.msra.mxu0 %v522_v4 }
  0x66   : > { %453 = vmatmul.mubr.msk.bf16.vlgmr.msra.gmra.mrb[0].mxu0 %vm253_vm1, %v523_v5 }
 0x139   : > { %v291_v7 = vpop.f32.mrb[0].mxu0 }
 0x13a   : > { %v454_v8 = vpop.f32.mrb[1].mxu0  ;;  %v292_v10 = vadd.f32 %v416_v6, %v291_v7 }
 0x13b   : > { %v294_v9 = vpop.f32.mrb[2].mxu0 }
 0x13c   : > { %v295_v11 = vadd.f32 %v416_v6, %v294_v9  ;;  %v455_v12 = vpop.f32.mrb[3].mxu0 }
 0x13e   : > { %v437_v13 = vpack.c.bf16 %v295_v11, %v292_v10 }
 0x140   : > { %438 = vst [vmem:[%s203_s8] sm:$0xff] %v437_v13  }
 0x141   : > { %595 = shalt.err (!%p592_p7)
}
 0x142   : > { %s596_s30 = scalar_lea.hbm %s849_s5, 128  ;;  %s600_s10 = scalar_lea.hbm %s896_s3, 256 }
 0x143   : > { %p597_p9 = scmp.ne.s32.totalorder %s849_s5, %s596_s30  ;;  %p601_p5 = scmp.lt.u32.totalorder %s849_s5, %s896_s3 }
 0x144   : > { %p602_p2 = scmp.lt.u32.totalorder %s600_s10, %s596_s30  ;;  %p604_p4 = scmp.lt.u32.totalorder %s596_s30, %s849_s5 }
 0x145   : > { %p598_p1 = pnand %p597_p9, %p777_p12 }
 0x146   : > { %p603_p11 = por %p602_p2, %p601_p5 }
 0x147   : > { %p599_p0 = pneg %p598_p1 }
 0x148   : > { %p605_p6 = por %p604_p4, %p603_p11 }
 0x14a   : > { %p606_p8 = pnand %p605_p6, %p599_p0 }
 0x14c   : > { %609 = shalt.err (!%p606_p8)
}
 0x14d   : > { %s661_s20 = smov 64   ;;  %s662_s8 = smov 4  }
 0x14e   : > { %462 = dma.vmem_to_hbm [thread:$0]  (%p777_p12), %s844_s9, 128, %s849_s5, %s309_s27, %s661_s20, %s661_s20, %s662_s8  }
 0x14f PF: > { %s337_s4 = sand.u32 1, %s640_s12   ;;  %p911_p10 = scmp.ne.s32.totalorder %s901_s19, 0 }
 0x150   : > { %p912_p13 = scmp.ge.s32.totalorder %s652_s15, 2  ;;  %s338_s25 = scalar_lea.sflag [#allocation4], %s337_s4 }
 0x152   : > { %p473_p3 = pnand %p912_p13, %p911_p10 }
 0x154   : > { %635 = dma.done.wait (!%p473_p3), %s338_s25, 128  }
 0x155   : > { %637 = vsyncadd (!%p473_p3), %s338_s25, 4294967168  ;;  %p17_p7 = scmp.ge.s32.totalorder %s739_s24, 4   ;;  %s913_s12 = smov %s644_s13 }
 0x156   : > { %s914_s13 = smov %s648_s14  ;;  %s915_s14 = smov %s773_s17 }
 0x157   : > { %s916_s15 = smov %s739_s24  ;;  %19 = sbr.rel (!%p17_p7) target bundleno = 6 (0x6), region = 81 }
 0x15e   :  { %343 = vsyncpa [#allocation3], 1 }
 0x15f   :  { %345 = vsyncpa [#allocation3 + $0x1], 1 }
 0x160   :  { %346 = vsyncpa [#allocation6], 1 }
 0x161   :  { %347 = vsyncpa [#allocation4], 1 }
 0x162   :  { %349 = vsyncpa [#allocation4 + $0x1], 1 }

</bundles_post_ra>
